<compile_context>
chip_gen: v7x
topology: tpu7x:2x2x1
jax: 0.10.0
libtpu: 0.0.40
codegen_flags: <defaults>
</compile_context>

<pallas_src>
import jax
import jax.numpy as jnp
from jax.experimental import pallas as pl
from jax.experimental.pallas import tpu as pltpu

LANE = 128      # final-layer N (output) padded to a multiple of this -> lane-dense stores
SUBLANE = 16    # batch tiles rounded to the bf16 sublane pack


def _round_up(x, m):
    return (x + m - 1) // m * m


def _choose_batch_tile(B):
    """Pick (TM, Bp): multiple of 16 sublanes, >=2 tiles when there is enough work
    (v7x has 2 TensorCores), cap 1024 rows, keep batch-pad waste (Bp - B) small."""
    if B <= 2 * SUBLANE:
        tm = _round_up(max(B, 1), SUBLANE)
        return tm, tm
    cap = 1024
    n_tiles = max(2, -(-B // cap))
    tm = min(cap, _round_up(-(-B // n_tiles), SUBLANE))
    bp = _round_up(B, tm)
    return tm, bp


# ----------------------------------------------------------------------------- #
# Pallas kernel: one batch tile through encoder MLP + decoder MLP + recon layer.
# Weights/biases are VMEM-resident (constant index_map) across all batch tiles.
# ----------------------------------------------------------------------------- #
def _enc_dec_kernel(
    x_ref,            # (TM, E)   f32  x_embed tile at true feature width
    w1_ref, b1_ref,   # (E, D1)  bf16, (1, D1) f32   encoder layer 1
    w2_ref, b2_ref,   # (D1, D2) bf16, (1, D2) f32   encoder layer 2 -> latent
    w3_ref, b3_ref,   # (D2, D1) bf16, (1, D1) f32   decoder layer 1
    w4_ref, b4_ref,   # (D1, Ep) bf16, (1, Ep) f32   reconstruction layer (N padded to 128)
    rec_ref,          # out: (TM, Ep) bf16 reconstructed embeddings (lane-dense)
):
    # Cast once for the MXU; bf16 matmuls with f32 accumulation; bias-add + ReLU on the
    # f32 accumulator (v5e VPU has no bf16), then downcast for the next MXU pass.
    x = x_ref[...].astype(jnp.bfloat16)
    h = jnp.dot(x, w1_ref[...], preferred_element_type=jnp.float32) + b1_ref[...]
    h = jnp.maximum(h, 0.0).astype(jnp.bfloat16)
    h = jnp.dot(h, w2_ref[...], preferred_element_type=jnp.float32) + b2_ref[...]
    h = jnp.maximum(h, 0.0).astype(jnp.bfloat16)
    h = jnp.dot(h, w3_ref[...], preferred_element_type=jnp.float32) + b3_ref[...]
    h = jnp.maximum(h, 0.0).astype(jnp.bfloat16)
    rec = jnp.dot(h, w4_ref[...], preferred_element_type=jnp.float32) + b4_ref[...]
    rec_ref[...] = rec.astype(rec_ref.dtype)          # bf16, lane-dense store


# ----------------------------------------------------------------------------- #
# Wrapper
# ----------------------------------------------------------------------------- #
def prepare_kernel_params(params):
    """Cast weights to bf16 at TRUE widths; only the final layer's N dim (and its bias)
    is zero-padded to a multiple of 128 so the kernel output stays lane-dense.
    Zero-padding is exact (zero weight columns -> zero output columns, stripped later)."""
    E, D1 = params["w1"].shape
    D2 = params["w2"].shape[1]
    Ep = _round_up(E, LANE)

    def w(a):
        return a.astype(jnp.bfloat16)

    def b(a):
        return a.astype(jnp.float32).reshape(1, -1)

    w4 = jnp.zeros((D1, Ep), jnp.bfloat16).at[:, :E].set(params["w4"].astype(jnp.bfloat16))
    b4 = jnp.zeros((1, Ep), jnp.float32).at[:, :E].set(
        params["b4"].astype(jnp.float32).reshape(1, -1)
    )
    return {
        "w1": w(params["w1"]), "b1": b(params["b1"]),
        "w2": w(params["w2"]), "b2": b(params["b2"]),
        "w3": w(params["w3"]), "b3": b(params["b3"]),
        "w4": w4, "b4": b4,
    }


@jax.jit
def encoder_decoder_forward(X, emb_tables, kparams):
    """Returns (x_embed, x_embed_rec, mask) like EncoderDecoderModel._forward (eval)."""
    n_cat = len(emb_tables)

    # --- encoder._get_embeddings: categorical embedding lookups + continuous passthrough
    cat_idx = X[:, :n_cat].astype(jnp.int32)                       # (B, n_cat)
    cat_embs = [jnp.take(tbl, cat_idx[:, i], axis=0) for i, tbl in enumerate(emb_tables)]
    x_cont = X[:, n_cat:]                                          # (B, n_cont)
    x_embed = jnp.concatenate(cat_embs + [x_cont], axis=1)         # (B, E) f32

    B, E = x_embed.shape
    D1 = kparams["w1"].shape[1]
    D2 = kparams["w2"].shape[1]
    Ep = kparams["w4"].shape[1]

    TM, Bp = _choose_batch_tile(B)
    # Only the batch axis ever needs padding (zero rows are cheap and sliced off below).
    x_in = x_embed if Bp == B else jnp.pad(x_embed, ((0, Bp - B), (0, 0)))

    weight_bytes = 2 * (E * D1 + D1 * D2 + D2 * D1 + D1 * Ep)          # bf16
    bias_bytes = 4 * (D1 + D2 + D1 + Ep)                               # f32
    flops = 2 * Bp * (E * D1 + D1 * D2 + D2 * D1 + D1 * Ep)
    bytes_accessed = Bp * E * 4 + Bp * Ep * 2 + weight_bytes + bias_bytes

    # VMEM budget: double-buffered act/out tiles + double-buffered constant weight blocks,
    # with 2x headroom; floored at 32 MiB (safe on all generations, < v7x physical 64 MiB).
    tile_bytes = (TM * E * 4 + TM * Ep * 2) * 2
    vmem_needed = tile_bytes + 2 * (weight_bytes + bias_bytes)
    vmem_limit = int(min(100 << 20, max(32 << 20, 2 * vmem_needed)))

    def const_spec(shape):
        return pl.BlockSpec(shape, lambda i: (0, 0))

    rec_pad = pl.pallas_call(
        _enc_dec_kernel,
        out_shape=jax.ShapeDtypeStruct((Bp, Ep), jnp.bfloat16),
        grid=(Bp // TM,),
        in_specs=[
            pl.BlockSpec((TM, E), lambda i: (i, 0)),
            const_spec((E, D1)), const_spec((1, D1)),
            const_spec((D1, D2)), const_spec((1, D2)),
            const_spec((D2, D1)), const_spec((1, D1)),
            const_spec((D1, Ep)), const_spec((1, Ep)),
        ],
        out_specs=pl.BlockSpec((TM, Ep), lambda i: (i, 0)),
        compiler_params=pltpu.CompilerParams(
            dimension_semantics=("parallel",),
            vmem_limit_bytes=vmem_limit,
        ),
        cost_estimate=pl.CostEstimate(
            flops=flops, transcendentals=0, bytes_accessed=bytes_accessed
        ),
    )(
        x_in,
        kparams["w1"], kparams["b1"],
        kparams["w2"], kparams["b2"],
        kparams["w3"], kparams["b3"],
        kparams["w4"], kparams["b4"],
    )

    # Strip batch/output padding (identity when no padding was needed).
    x_embed_rec = rec_pad if (Bp == B and Ep == E) else rec_pad[:B, :E]
    mask = jnp.ones((B, E), jnp.float32)   # eval-mode mask, produced outside the kernel
    return x_embed, x_embed_rec, mask


# ----------------------------------------------------------------------------- #
# Deterministic parameter construction (synthetic "TabMlp" encoder + decoder).
# ----------------------------------------------------------------------------- #
def init_params(key, cat_vocab_sizes, cat_emb_dims, n_cont, mlp_hidden_dims):
    keys = jax.random.split(key, 16)
    ki = iter(range(16))

    emb_tables = []
    for vocab, edim in zip(cat_vocab_sizes, cat_emb_dims):
        emb_tables.append(
            0.1 * jax.random.normal(keys[next(ki)], (vocab, edim), dtype=jnp.float32)
        )

    embed_dim = sum(cat_emb_dims) + n_cont
    d1, d2 = mlp_hidden_dims

    def dense(kw, kb, fan_in, fan_out):
        scale = 1.0 / jnp.sqrt(jnp.float32(fan_in))
        w = scale * jax.random.normal(keys[kw], (fan_in, fan_out), dtype=jnp.float32)
        b = 0.01 * jax.random.normal(keys[kb], (1, fan_out), dtype=jnp.float32)
        return w, b

    # Encoder MLP: embed_dim -> d1 -> d2; decoder (reversed): d2 -> d1 -> embed_dim
    w1, b1 = dense(next(ki), next(ki), embed_dim, d1)
    w2, b2 = dense(next(ki), next(ki), d1, d2)
    w3, b3 = dense(next(ki), next(ki), d2, d1)
    w4, b4 = dense(next(ki), next(ki), d1, embed_dim)

    return {
        "emb_tables": emb_tables,
        "w1": w1, "b1": b1, "w2": w2, "b2": b2,
        "w3": w3, "b3": b3, "w4": w4, "b4": b4,
    }


def reference_forward(X, params):
    """Pure-JAX f32 reference of the eval forward path."""
    n_cat = len(params["emb_tables"])
    cat_idx = X[:, :n_cat].astype(jnp.int32)
    cat_embs = [jnp.take(t, cat_idx[:, i], axis=0) for i, t in enumerate(params["emb_tables"])]
    x_embed = jnp.concatenate(cat_embs + [X[:, n_cat:]], axis=1)
    h = jnp.maximum(x_embed @ params["w1"] + params["b1"], 0.0)
    h = jnp.maximum(h @ params["w2"] + params["b2"], 0.0)
    h = jnp.maximum(h @ params["w3"] + params["b3"], 0.0)
    rec = h @ params["w4"] + params["b4"]
    return x_embed, rec, jnp.ones_like(x_embed)


if __name__ == "__main__":
    key = jax.random.PRNGKey(0)
    k_params, k_cat, k_cont = jax.random.split(key, 3)

    # Small synthetic tabular problem.
    B = 8
    cat_vocab_sizes = (5, 7)
    cat_emb_dims = (8, 8)
    n_cont = 16
    mlp_hidden_dims = (64, 32)   # encoder hidden dims; decoder uses the reverse

    params = init_params(k_params, cat_vocab_sizes, cat_emb_dims, n_cont, mlp_hidden_dims)
    kparams = prepare_kernel_params(params)
    emb_tables = params["emb_tables"]

    # Build X = [cat indices | continuous features], mimicking widedeep's column layout.
    cat_cols = jnp.stack(
        [
            jax.random.randint(jax.random.fold_in(k_cat, i), (B,), 0, v)
            for i, v in enumerate(cat_vocab_sizes)
        ],
        axis=1,
    ).astype(jnp.float32)                                   # (B, n_cat)
    cont_cols = jax.random.normal(k_cont, (B, n_cont), dtype=jnp.float32)
    X = jnp.concatenate([cat_cols, cont_cols], axis=1)      # (B, n_cat + n_cont)

    x_embed, x_embed_rec, mask = encoder_decoder_forward(X, emb_tables, kparams)
    jax.block_until_ready((x_embed, x_embed_rec, mask))

    embed_dim = sum(cat_emb_dims) + n_cont
    assert x_embed.shape == (B, embed_dim)
    assert x_embed_rec.shape == (B, embed_dim)
    assert mask.shape == (B, embed_dim)
    assert bool(jnp.all(mask == 1.0))
    assert bool(jnp.all(jnp.isfinite(x_embed_rec.astype(jnp.float32))))

    # Validate against the pure-JAX f32 reference (bf16 matmul/output tolerance).
    x_embed_ref, rec_ref, _ = reference_forward(X, params)
    assert bool(jnp.allclose(x_embed, x_embed_ref, atol=1e-6, rtol=1e-6))
    assert bool(
        jnp.allclose(x_embed_rec.astype(jnp.float32), rec_ref, atol=5e-2, rtol=5e-2)
    )

    print("KERNEL_OK")
</pallas_src>

<mosaic_0001>
module attributes {stable_mosaic.version = 11 : i64} {
  func.func @_enc_dec_kernel(%arg0: i32, %arg1: memref<16x32xf32, #tpu.memory_space<vmem>>, %arg2: memref<32x64xbf16, #tpu.memory_space<vmem>>, %arg3: memref<1x64xf32, #tpu.memory_space<vmem>>, %arg4: memref<64x32xbf16, #tpu.memory_space<vmem>>, %arg5: memref<1x32xf32, #tpu.memory_space<vmem>>, %arg6: memref<32x64xbf16, #tpu.memory_space<vmem>>, %arg7: memref<1x64xf32, #tpu.memory_space<vmem>>, %arg8: memref<64x128xbf16, #tpu.memory_space<vmem>>, %arg9: memref<1x128xf32, #tpu.memory_space<vmem>>, %arg10: memref<16x128xbf16, #tpu.memory_space<vmem>>) attributes {dimension_semantics = [#tpu.dimension_semantics<parallel>], iteration_bounds = array<i64: 1>, scalar_prefetch = 0 : i64, scratch_operands = 0 : i64, tpu.core_type = #tpu.core_type<tc>, window_params = [{transform_indices = @transform_0, window_bounds = array<i64: 16, 32>}, {pipeline_mode = #tpu.pipeline_mode<synchronous>, transform_indices = @transform_1, window_bounds = array<i64: 32, 64>}, {pipeline_mode = #tpu.pipeline_mode<synchronous>, transform_indices = @transform_2, window_bounds = array<i64: 1, 64>}, {pipeline_mode = #tpu.pipeline_mode<synchronous>, transform_indices = @transform_3, window_bounds = array<i64: 64, 32>}, {pipeline_mode = #tpu.pipeline_mode<synchronous>, transform_indices = @transform_4, window_bounds = array<i64: 1, 32>}, {pipeline_mode = #tpu.pipeline_mode<synchronous>, transform_indices = @transform_5, window_bounds = array<i64: 32, 64>}, {pipeline_mode = #tpu.pipeline_mode<synchronous>, transform_indices = @transform_6, window_bounds = array<i64: 1, 64>}, {pipeline_mode = #tpu.pipeline_mode<synchronous>, transform_indices = @transform_7, window_bounds = array<i64: 64, 128>}, {pipeline_mode = #tpu.pipeline_mode<synchronous>, transform_indices = @transform_8, window_bounds = array<i64: 1, 128>}, {transform_indices = @transform_9, window_bounds = array<i64: 16, 128>}]} {
    %c0 = arith.constant 0 : index
    %c0_0 = arith.constant 0 : index
    %0 = vector.load %arg1[%c0, %c0_0] : memref<16x32xf32, #tpu.memory_space<vmem>>, vector<16x32xf32>
    %1 = arith.truncf %0 : vector<16x32xf32> to vector<16x32xbf16>
    %c0_1 = arith.constant 0 : index
    %c0_2 = arith.constant 0 : index
    %2 = vector.load %arg2[%c0_1, %c0_2] : memref<32x64xbf16, #tpu.memory_space<vmem>>, vector<32x64xbf16>
    %cst = arith.constant dense<0.000000e+00> : vector<16x64xf32>
    %3 = tpu.matmul %1, %2, %cst {dimension_numbers = #tpu.dot_dimension_numbers<[1], [0], [0], [1], [0, 0, 1, 1], [], []>} : vector<16x32xbf16>, vector<32x64xbf16>, vector<16x64xf32> -> vector<16x64xf32>
    %c0_3 = arith.constant 0 : index
    %c0_4 = arith.constant 0 : index
    %4 = vector.load %arg3[%c0_3, %c0_4] : memref<1x64xf32, #tpu.memory_space<vmem>>, vector<1x64xf32>
    %5 = vector.broadcast %4 : vector<1x64xf32> to vector<16x64xf32>
    %6 = arith.addf %3, %5 : vector<16x64xf32>
    %cst_5 = arith.constant 0.000000e+00 : f32
    %7 = vector.broadcast %cst_5 : f32 to vector<16x64xf32>
    %8 = arith.maximumf %6, %7 : vector<16x64xf32>
    %9 = arith.truncf %8 : vector<16x64xf32> to vector<16x64xbf16>
    %c0_6 = arith.constant 0 : index
    %c0_7 = arith.constant 0 : index
    %10 = vector.load %arg4[%c0_6, %c0_7] : memref<64x32xbf16, #tpu.memory_space<vmem>>, vector<64x32xbf16>
    %cst_8 = arith.constant dense<0.000000e+00> : vector<16x32xf32>
    %11 = tpu.matmul %9, %10, %cst_8 {dimension_numbers = #tpu.dot_dimension_numbers<[1], [0], [0], [1], [0, 0, 1, 1], [], []>} : vector<16x64xbf16>, vector<64x32xbf16>, vector<16x32xf32> -> vector<16x32xf32>
    %c0_9 = arith.constant 0 : index
    %c0_10 = arith.constant 0 : index
    %12 = vector.load %arg5[%c0_9, %c0_10] : memref<1x32xf32, #tpu.memory_space<vmem>>, vector<1x32xf32>
    %13 = vector.broadcast %12 : vector<1x32xf32> to vector<16x32xf32>
    %14 = arith.addf %11, %13 : vector<16x32xf32>
    %cst_11 = arith.constant 0.000000e+00 : f32
    %15 = vector.broadcast %cst_11 : f32 to vector<16x32xf32>
    %16 = arith.maximumf %14, %15 : vector<16x32xf32>
    %17 = arith.truncf %16 : vector<16x32xf32> to vector<16x32xbf16>
    %c0_12 = arith.constant 0 : index
    %c0_13 = arith.constant 0 : index
    %18 = vector.load %arg6[%c0_12, %c0_13] : memref<32x64xbf16, #tpu.memory_space<vmem>>, vector<32x64xbf16>
    %cst_14 = arith.constant dense<0.000000e+00> : vector<16x64xf32>
    %19 = tpu.matmul %17, %18, %cst_14 {dimension_numbers = #tpu.dot_dimension_numbers<[1], [0], [0], [1], [0, 0, 1, 1], [], []>} : vector<16x32xbf16>, vector<32x64xbf16>, vector<16x64xf32> -> vector<16x64xf32>
    %c0_15 = arith.constant 0 : index
    %c0_16 = arith.constant 0 : index
    %20 = vector.load %arg7[%c0_15, %c0_16] : memref<1x64xf32, #tpu.memory_space<vmem>>, vector<1x64xf32>
    %21 = vector.broadcast %20 : vector<1x64xf32> to vector<16x64xf32>
    %22 = arith.addf %19, %21 : vector<16x64xf32>
    %cst_17 = arith.constant 0.000000e+00 : f32
    %23 = vector.broadcast %cst_17 : f32 to vector<16x64xf32>
    %24 = arith.maximumf %22, %23 : vector<16x64xf32>
    %25 = arith.truncf %24 : vector<16x64xf32> to vector<16x64xbf16>
    %c0_18 = arith.constant 0 : index
    %c0_19 = arith.constant 0 : index
    %26 = vector.load %arg8[%c0_18, %c0_19] : memref<64x128xbf16, #tpu.memory_space<vmem>>, vector<64x128xbf16>
    %cst_20 = arith.constant dense<0.000000e+00> : vector<16x128xf32>
    %27 = tpu.matmul %25, %26, %cst_20 {dimension_numbers = #tpu.dot_dimension_numbers<[1], [0], [0], [1], [0, 0, 1, 1], [], []>} : vector<16x64xbf16>, vector<64x128xbf16>, vector<16x128xf32> -> vector<16x128xf32>
    %c0_21 = arith.constant 0 : index
    %c0_22 = arith.constant 0 : index
    %28 = vector.load %arg9[%c0_21, %c0_22] : memref<1x128xf32, #tpu.memory_space<vmem>>, vector<1x128xf32>
    %29 = vector.broadcast %28 : vector<1x128xf32> to vector<16x128xf32>
    %30 = arith.addf %27, %29 : vector<16x128xf32>
    %31 = arith.truncf %30 : vector<16x128xf32> to vector<16x128xbf16>
    %c0_23 = arith.constant 0 : index
    %c0_24 = arith.constant 0 : index
    %32 = vector.load %arg10[%c0_23, %c0_24] : memref<16x128xbf16, #tpu.memory_space<vmem>>, vector<16x128xbf16>
    tpu.vector_store %arg10[%c0_23, %c0_24], %31 {strides = array<i32>} : memref<16x128xbf16, #tpu.memory_space<vmem>>, vector<16x128xbf16>,
    return
  }
  func.func @transform_0(%arg0: i32) -> (i32, i32) {
    %c0_i32 = arith.constant 0 : i32
    %c0_i32_0 = arith.constant 0 : i32
    return %arg0, %c0_i32 : i32, i32
  }
  func.func @transform_1(%arg0: i32) -> (i32, i32) {
    %c0_i32 = arith.constant 0 : i32
    %c0_i32_0 = arith.constant 0 : i32
    %c0_i32_1 = arith.constant 0 : i32
    return %c0_i32, %c0_i32_0 : i32, i32
  }
  func.func @transform_2(%arg0: i32) -> (i32, i32) {
    %c0_i32 = arith.constant 0 : i32
    %c0_i32_0 = arith.constant 0 : i32
    %c0_i32_1 = arith.constant 0 : i32
    return %c0_i32, %c0_i32_0 : i32, i32
  }
  func.func @transform_3(%arg0: i32) -> (i32, i32) {
    %c0_i32 = arith.constant 0 : i32
    %c0_i32_0 = arith.constant 0 : i32
    %c0_i32_1 = arith.constant 0 : i32
    return %c0_i32, %c0_i32_0 : i32, i32
  }
  func.func @transform_4(%arg0: i32) -> (i32, i32) {
    %c0_i32 = arith.constant 0 : i32
    %c0_i32_0 = arith.constant 0 : i32
    %c0_i32_1 = arith.constant 0 : i32
    return %c0_i32, %c0_i32_0 : i32, i32
  }
  func.func @transform_5(%arg0: i32) -> (i32, i32) {
    %c0_i32 = arith.constant 0 : i32
    %c0_i32_0 = arith.constant 0 : i32
    %c0_i32_1 = arith.constant 0 : i32
    return %c0_i32, %c0_i32_0 : i32, i32
  }
  func.func @transform_6(%arg0: i32) -> (i32, i32) {
    %c0_i32 = arith.constant 0 : i32
    %c0_i32_0 = arith.constant 0 : i32
    %c0_i32_1 = arith.constant 0 : i32
    return %c0_i32, %c0_i32_0 : i32, i32
  }
  func.func @transform_7(%arg0: i32) -> (i32, i32) {
    %c0_i32 = arith.constant 0 : i32
    %c0_i32_0 = arith.constant 0 : i32
    %c0_i32_1 = arith.constant 0 : i32
    return %c0_i32, %c0_i32_0 : i32, i32
  }
  func.func @transform_8(%arg0: i32) -> (i32, i32) {
    %c0_i32 = arith.constant 0 : i32
    %c0_i32_0 = arith.constant 0 : i32
    %c0_i32_1 = arith.constant 0 : i32
    return %c0_i32, %c0_i32_0 : i32, i32
  }
  func.func @transform_9(%arg0: i32) -> (i32, i32) {
    %c0_i32 = arith.constant 0 : i32
    %c0_i32_0 = arith.constant 0 : i32
    return %arg0, %c0_i32 : i32, i32
  }
}

</mosaic_0001>

<bundles_post_ra>
// kernel: encoder_decoder_forward.1
= control target key start
LH: loop header
LB: loop body
LE: loop exit
PB: predicated region body
PF: predicated region fallthrough
CT: control target
= control target key end

     0   :  { %v460_v0 = vmov 0.0   ;;  %vm461_vm0 = vmmov 0   ;;  %vm59_vm1 = vcmask 261120   ;;  %vm146_vm2 = vcmask 523264   ;;  %s593_s1 = inlined_call_operand.vmem [shape: bf16[32,64], index: 1, kind: input, shape index: {}]   ;;  %s594_s0 = inlined_call_operand.vmem [shape: f32[16,32], index: 0, kind: input, shape index: {}]   ;;  %s595_s3 = inlined_call_operand.vmem [shape: bf16[64,32], index: 3, kind: input, shape index: {}]   ;;  %s596_s2 = inlined_call_operand.vmem [shape: f32[1,64], index: 2, kind: input, shape index: {}]   ;;  %s597_s5 = inlined_call_operand.vmem [shape: bf16[32,64], index: 5, kind: input, shape index: {}]   ;;  %s598_s7 = inlined_call_operand.vmem [shape: bf16[64,128], index: 7, kind: input, shape index: {}]   ;;  %s599_s4 = inlined_call_operand.vmem [shape: f32[1,32], index: 4, kind: input, shape index: {}]   ;;  %s600_s6 = inlined_call_operand.vmem [shape: f32[1,64], index: 6, kind: input, shape index: {}]   ;;  %s601_s8 = inlined_call_operand.vmem [shape: f32[1,128], index: 8, kind: input, shape index: {}]   ;;  %s602_s9 = inlined_call_operand.vmem [shape: bf16[16,128], index: 9, kind: output, shape index: {}]  }
   0x1   :  { %406 = vmatprep.subr.bf16.mxu1 %v460_v0  ;;  %v448_v1 = vld [vmem:[%s593_s1] sm:$0xff]   ;;  %410 = vmatprep.mubr.msk.bf16.mxu1 %vm461_vm0, %v460_v0  ;;  %v449_v2 = vld [vmem:[%s593_s1 + $0x8] sm:$0xff]   ;;  %v452_v8 = vld [vmem:[%s595_s3 + $0x10] sm:$0xff]  }
   0x2   :  { %426 = vmatprep.subr.bf16.mxu0 %v460_v0  ;;  %430 = vmatprep.mubr.msk.bf16.mxu0 %vm461_vm0, %v460_v0  ;;  %v33_v3 = vld [vmem:[%s594_s0] sm:$0xff]  ;;  %v34_v4 = vld [vmem:[%s594_s0 + $0x8] sm:$0xff]  ;;  %v453_v9 = vld [vmem:[%s595_s3 + $0x18] sm:$0xff]  }
   0x3   :  { %407 = vmatpush3.bf16.msra.mxu1 %v448_v1  ;;  %v35_v5 = vpack.c.bf16 %v34_v4, %v33_v3  ;;  %v450_v6 = vld [vmem:[%s595_s3] sm:$0xff]   ;;  %v451_v7 = vld [vmem:[%s595_s3 + $0x8] sm:$0xff]   ;;  %v458_v34 = vld [vmem:[%s598_s7 + $0x10] sm:$0xff]  }
   0x4   :  { %408 = vmatprep.subr.bf16.mxu1 %v460_v0  ;;  %v361_v10 = vld [vmem:[%s596_s2] ss:$0 sm:$0xff]  ;;  %v455_v21 = vld [vmem:[%s597_s5 + $0x8] sm:$0xff]   ;;  %v459_v35 = vld [vmem:[%s598_s7 + $0x18] sm:$0xff]  }
   0x5   :  { %v454_v20 = vld [vmem:[%s597_s5] sm:$0xff]   ;;  %v457_v33 = vld [vmem:[%s598_s7 + $0x8] sm:$0xff]  }
   0x6   :  { %427 = vmatpush3.bf16.msra.mxu0 %v454_v20  ;;  %v365_v22 = vld [vmem:[%s599_s4] ss:$0 sm:$0xff] }
   0x7   :  { %409 = vmatpush3.bf16.msra.mxu1 %v449_v2  ;;  %428 = vmatprep.subr.bf16.mxu0 %v460_v0  ;;  %v456_v31 = vld [vmem:[%s598_s7] sm:$0xff]  }
   0x8   :  { %414 = vmatprep.subr.bf16.mxu1 %v460_v0  ;;  %v371_v36 = vld [vmem:[%s600_s6] ss:$0 sm:$0xff] }
   0x9   :  { %v375_v46 = vld [vmem:[%s601_s8] ss:$0 sm:$0xff] }
   0xa   :  { %411 = vmatmul.mubr.msk.bf16.vlgmr.msra.gmra.mrb[0].mxu1 %vm59_vm1, %v35_v5  ;;  %429 = vmatpush3.bf16.msra.mxu0 %v455_v21 }
   0xb   :  { %415 = vmatpush3.bf16.msra.mxu1 %v450_v6  ;;  %422 = vmatprep.mubr.msk.bf16.mxu1 %vm461_vm0, %v460_v0 }
   0xc   :  { %416 = vmatprep.subr.bf16.mxu1 %v460_v0  ;;  %434 = vmatprep.subr.bf16.mxu0 %v460_v0 }
   0xf   :  { %417 = vmatpush3.bf16.msra.mxu1 %v451_v7 }
  0x10   :  { %418 = vmatprep.subr.bf16.mxu1 %v460_v0 }
  0x13   :  { %419 = vmatpush3.bf16.msra.mxu1 %v452_v8 }
  0x14   :  { %420 = vmatprep.subr.bf16.mxu1 %v460_v0 }
  0x17   :  { %421 = vmatpush3.bf16.msra.mxu1 %v453_v9 }
  0xdd   :  { %v97_v11 = vpop.f32.mrb[0].mxu1 }
  0xde   :  { %v98_v12 = vadd.f32 %v361_v10, %v97_v11  ;;  %v412_v13 = vpop.f32.mrb[1].mxu1 }
  0xdf   :  { %v100_v14 = vpop.f32.mrb[2].mxu1 }
  0xe0   :  { %v101_v15 = vadd.f32 %v361_v10, %v100_v14  ;;  %v413_v16 = vpop.f32.mrb[3].mxu1  ;;  %v104_v17 = vmax.f32 %v98_v12, 0.0 }
  0xe2   :  { %v105_v18 = vmax.f32 %v101_v15, 0.0 }
  0xe4   :  { %v106_v19 = vpack.c.bf16 %v105_v18, %v104_v17 }
  0xe6   :  { %423 = vmatmul.mubr.msk.bf16.vlgmr.msra.gmra.mrb[4].mxu1 %vm146_vm2, %v106_v19 }
 0x1b9   :  { %v184_v23 = vpop.f32.mrb[4].mxu1 }
 0x1ba   :  { %v185_v24 = vadd.f32 %v365_v22, %v184_v23  ;;  %v424_v25 = vpop.f32.mrb[5].mxu1 }
 0x1bb   :  { %v187_v26 = vpop.f32.mrb[6].mxu1 }
 0x1bc   :  { %v188_v27 = vadd.f32 %v365_v22, %v187_v26  ;;  %v425_v28 = vpop.f32.mrb[7].mxu1  ;;  %v191_v29 = vmax.f32 %v185_v24, 0.0 }
 0x1be   :  { %v192_v30 = vmax.f32 %v188_v27, 0.0 }
 0x1c0   :  { %v193_v32 = vpack.c.bf16 %v192_v30, %v191_v29 }
 0x1c2   :  { %431 = vmatmul.mubr.msk.bf16.vlgmr.msra.gmra.mrb[0].mxu0 %vm59_vm1, %v193_v32 }
 0x1c3   :  { %435 = vmatpush3.bf16.msra.mxu0 %v456_v31  ;;  %442 = vmatprep.mubr.msk.bf16.mxu0 %vm461_vm0, %v460_v0 }
 0x1c4   :  { %436 = vmatprep.subr.bf16.mxu0 %v460_v0 }
 0x1c7   :  { %437 = vmatpush3.bf16.msra.mxu0 %v457_v33 }
 0x1c8   :  { %438 = vmatprep.subr.bf16.mxu0 %v460_v0 }
 0x1cb   :  { %439 = vmatpush3.bf16.msra.mxu0 %v458_v34 }
 0x1cc   :  { %440 = vmatprep.subr.bf16.mxu0 %v460_v0 }
 0x1cf   :  { %441 = vmatpush3.bf16.msra.mxu0 %v459_v35 }
 0x295   :  { %v254_v37 = vpop.f32.mrb[0].mxu0 }
 0x296   :  { %v255_v38 = vadd.f32 %v371_v36, %v254_v37  ;;  %v432_v39 = vpop.f32.mrb[1].mxu0 }
 0x297   :  { %v257_v40 = vpop.f32.mrb[2].mxu0 }
 0x298   :  { %v258_v41 = vadd.f32 %v371_v36, %v257_v40  ;;  %v433_v42 = vpop.f32.mrb[3].mxu0  ;;  %v261_v43 = vmax.f32 %v255_v38, 0.0 }
 0x29a   :  { %v262_v44 = vmax.f32 %v258_v41, 0.0 }
 0x29c   :  { %v263_v45 = vpack.c.bf16 %v262_v44, %v261_v43 }
 0x29e   :  { %443 = vmatmul.mubr.msk.bf16.vlgmr.msra.gmra.mrb[4].mxu0 %vm146_vm2, %v263_v45 }
 0x371   :  { %v340_v47 = vpop.f32.mrb[4].mxu0 }
 0x372   :  { %v444_v48 = vpop.f32.mrb[5].mxu0  ;;  %v341_v50 = vadd.f32 %v375_v46, %v340_v47 }
 0x373   :  { %v343_v49 = vpop.f32.mrb[6].mxu0 }
 0x374   :  { %v344_v51 = vadd.f32 %v375_v46, %v343_v49  ;;  %v445_v52 = vpop.f32.mrb[7].mxu0 }
 0x376   :  { %v388_v53 = vpack.c.bf16 %v344_v51, %v341_v50 }
 0x378   :  { %389 = vst [vmem:[%s602_s9] sm:$0xff] %v388_v53  }

</bundles_post_ra>
